<compile_context>
chip_gen: v7x
topology: tpu7x:2x2x1
jax: 0.10.0
libtpu: 0.0.40
codegen_flags: <defaults>
</compile_context>

<pallas_src>
import jax
import jax.numpy as jnp
from jax.experimental import pallas as pl
from jax.experimental.pallas import tpu as pltpu

_SCALE = -0.0001                 # torch: return -l_d * 0.0001
_MIN_TILES = 2                   # v7x has 2 TensorCores; let both stream
_TARGET_BLOCK_BYTES = 2 << 20    # ~2 MiB per input block per grid step
_MAX_BLOCK_BYTES = 6 << 20       # VMEM safety cap per input block
_TINY_BYTES = 256 << 10          # below this, pure JAX beats the launch cost


def _make_disc_loss_kernel(n, tile_n, needs_mask):
    """Per-tile partial sum of row-wise L2 norms of (z_hat - z)."""

    def kernel(zh_ref, z_ref, out_ref):
        # Cast to f32 in-kernel: HBM only moves the narrow native dtype.
        diff = zh_ref[...].astype(jnp.float32) - z_ref[...].astype(jnp.float32)
        row_ss = jnp.sum(diff * diff, axis=1, keepdims=True)    # (tile_n, 1) lane reduce
        row_norm = jnp.sqrt(row_ss)                              # per-row L2 norm (EUP)
        if needs_mask:
            # Ragged last tile: rows >= remaining are padded/undefined -> zero them.
            rem = n - pl.program_id(0) * tile_n
            rows = jax.lax.broadcasted_iota(jnp.int32, row_norm.shape, 0)
            row_norm = jnp.where(rows < rem, row_norm, 0.0)
        tile_sum = jnp.sum(row_norm, keepdims=True)              # (1, 1)
        # Lane-dense unmasked store of this tile's partial into its own block.
        out_ref[...] = jnp.broadcast_to(tile_sum, out_ref.shape)

    return kernel


def _reference_loss(z_hat, z):
    """Pure-JAX reference (also the tiny-input fast path)."""
    diff = z_hat.astype(jnp.float32) - z.astype(jnp.float32)
    l_d = jnp.mean(jnp.sqrt(jnp.sum(diff * diff, axis=1)))
    return l_d * _SCALE


def discriminator_loss(z_hat, z, *, tile_n=None, vmem_limit_bytes=None,
                       min_pallas_bytes=_TINY_BYTES):
    """JAX wrapper mirroring DiscriminatorLoss.forward(z_hat, z)."""
    assert z_hat.ndim == 2 and z_hat.shape == z.shape, (z_hat.shape, z.shape)
    n, d = z_hat.shape
    itemsize = jnp.dtype(z_hat.dtype).itemsize
    row_bytes = d * itemsize
    in_bytes = n * row_bytes
    # Sublane packing for the second-to-last block dim: f32->8, bf16->16, i8->32.
    pack = max(8, 32 // max(itemsize, 1))

    # Tiny batches: launch + pipeline fill/drain dominate -> let XLA fuse it.
    # Extreme-d edge case: even `pack` rows would blow the block-byte budget.
    if in_bytes < min_pallas_bytes or pack * row_bytes > _MAX_BLOCK_BYTES:
        return _reference_loss(z_hat, z)

    # ---- tile sizing (bytes-driven, not a fixed row cap) --------------------
    if tile_n is None:
        tile_n = max(_TARGET_BLOCK_BYTES // row_bytes, 1)
    tile_n = max((int(tile_n) // pack) * pack, pack)

    n_ceil = ((n + pack - 1) // pack) * pack
    tile_n = min(tile_n, n_ceil)                          # never larger than the batch

    # Clamp block *bytes*, not just rows (VMEM safety on v7x's 64 MiB/TC).
    max_rows_vmem = max((_MAX_BLOCK_BYTES // row_bytes) // pack * pack, pack)
    tile_n = min(tile_n, max_rows_vmem)

    # Guarantee >= _MIN_TILES grid steps when the batch allows it, so the
    # "parallel" grid axis can shard across both TensorCores on v7x.
    if n > pack and pl.cdiv(n, tile_n) < _MIN_TILES:
        tile_n = max(((pl.cdiv(n, _MIN_TILES) + pack - 1) // pack) * pack, pack)

    n_tiles = pl.cdiv(n, tile_n)
    needs_mask = (n % tile_n) != 0                        # ragged last tile -> in-kernel mask

    # ---- tight VMEM request (actual usage + headroom) ------------------------
    if vmem_limit_bytes is None:
        block_in_bytes = tile_n * row_bytes
        need = 2 * 2 * block_in_bytes + 2 * (8 * 128 * 4) + (2 << 20)
        vmem_limit_bytes = int(min(max(need, 4 << 20), 48 << 20))

    partials = pl.pallas_call(
        _make_disc_loss_kernel(n, tile_n, needs_mask),
        out_shape=jax.ShapeDtypeStruct((n_tiles, 8, 128), jnp.float32),
        grid_spec=pltpu.PrefetchScalarGridSpec(
            num_scalar_prefetch=0,
            grid=(n_tiles,),
            in_specs=[pl.BlockSpec((tile_n, d), lambda i: (i, 0)),
                      pl.BlockSpec((tile_n, d), lambda i: (i, 0))],
            out_specs=pl.BlockSpec((1, 8, 128), lambda i: (i, 0, 0)),
        ),
        compiler_params=pltpu.CompilerParams(
            dimension_semantics=("parallel",),
            vmem_limit_bytes=int(vmem_limit_bytes)),
    )(z_hat, z)

    # One scalar per tile block (all 8x128 entries of a block are identical);
    # contiguous leading-axis slice, no strided gather.
    tile_sums = partials[:, 0, 0]                         # (n_tiles,)
    l_d = jnp.sum(tile_sums) / n                          # mean over real rows only
    return l_d * _SCALE


if __name__ == "__main__":
    key = jax.random.PRNGKey(0)
    k1, k2, k3, k4, k5, k6 = jax.random.split(key, 6)

    # Case 1: f32 inputs, small shape consistent with the module (bs=16, emb=64).
    #         Force the Pallas path (default would take the pure-JAX fast path);
    #         exercises the >=2-tile split (tile_n -> 8, 2 tiles, no mask).
    zh1 = jax.random.normal(k1, (16, 64), jnp.float32)
    z1 = jax.random.normal(k2, (16, 64), jnp.float32)
    l1 = discriminator_loss(zh1, z1, min_pallas_bytes=0)

    # Case 2: bf16 inputs, ragged batch (bs=40, emb=128, tile_n=16 -> 3 tiles,
    #         last tile has 8 real rows) -> exercises the in-kernel row mask
    #         (no jnp.pad HBM round-trip).
    zh2 = jax.random.normal(k3, (40, 128), jnp.float32).astype(jnp.bfloat16)
    z2 = jax.random.normal(k4, (40, 128), jnp.float32).astype(jnp.bfloat16)
    l2 = discriminator_loss(zh2, z2, tile_n=16, min_pallas_bytes=0)

    # Case 3: default auto-tiling path (bs=2048, emb=256, bf16) -> bytes-driven
    #         tile sizing + >=2-tile guarantee, no remainder.
    zh3 = jax.random.normal(k5, (2048, 256), jnp.float32).astype(jnp.bfloat16)
    z3 = jax.random.normal(k6, (2048, 256), jnp.float32).astype(jnp.bfloat16)
    l3 = discriminator_loss(zh3, z3)

    jax.block_until_ready((l1, l2, l3))

    r1 = _reference_loss(zh1, z1)
    r2 = _reference_loss(zh2, z2)
    r3 = _reference_loss(zh3, z3)

    assert jnp.allclose(l1, r1, rtol=1e-5, atol=1e-7), (l1, r1)
    assert jnp.allclose(l2, r2, rtol=1e-3, atol=1e-6), (l2, r2)
    assert jnp.allclose(l3, r3, rtol=1e-3, atol=1e-6), (l3, r3)

    print("KERNEL_OK")
</pallas_src>

<mosaic_0001>
module attributes {stable_mosaic.version = 11 : i64} {
  func.func @kernel(%arg0: i32, %arg1: memref<8x64xf32, #tpu.memory_space<vmem>>, %arg2: memref<8x64xf32, #tpu.memory_space<vmem>>, %arg3: memref<1x8x128xf32, #tpu.memory_space<vmem>>) attributes {dimension_semantics = [#tpu.dimension_semantics<parallel>], iteration_bounds = array<i64: 2>, scalar_prefetch = 0 : i64, scratch_operands = 0 : i64, tpu.core_type = #tpu.core_type<tc>, window_params = [{transform_indices = @transform_0, window_bounds = array<i64: 8, 64>}, {transform_indices = @transform_1, window_bounds = array<i64: 8, 64>}, {transform_indices = @transform_2, window_bounds = array<i64: 1, 8, 128>}]} {
    %c0 = arith.constant 0 : index
    %c0_0 = arith.constant 0 : index
    %0 = vector.load %arg1[%c0, %c0_0] : memref<8x64xf32, #tpu.memory_space<vmem>>, vector<8x64xf32>
    %c0_1 = arith.constant 0 : index
    %c0_2 = arith.constant 0 : index
    %1 = vector.load %arg2[%c0_1, %c0_2] : memref<8x64xf32, #tpu.memory_space<vmem>>, vector<8x64xf32>
    %2 = arith.subf %0, %1 : vector<8x64xf32>
    %3 = arith.mulf %2, %2 : vector<8x64xf32>
    %cst = arith.constant dense<0.000000e+00> : vector<8xf32>
    %4 = vector.multi_reduction <add>, %3, %cst [1] : vector<8x64xf32> to vector<8xf32>
    %5 = vector.shape_cast %4 : vector<8xf32> to vector<8x1xf32>
    %6 = math.sqrt %5 : vector<8x1xf32>
    %7 = vector.shape_cast %6 : vector<8x1xf32> to vector<1x8x1xf32>
    %cst_3 = arith.constant dense<0.000000e+00> : vector<1xf32>
    %8 = vector.multi_reduction <add>, %7, %cst_3 [1, 2] : vector<1x8x1xf32> to vector<1xf32>
    %9 = vector.shape_cast %8 : vector<1xf32> to vector<1x1x1xf32>
    %10 = vector.extract %9[0, 0, 0] : f32 from vector<1x1x1xf32>
    %11 = vector.broadcast %10 : f32 to vector<1x1xf32>
    %12 = vector.shape_cast %11 : vector<1x1xf32> to vector<1x1x1xf32>
    %13 = vector.broadcast %12 : vector<1x1x1xf32> to vector<1x8x128xf32>
    %c0_4 = arith.constant 0 : index
    %c0_5 = arith.constant 0 : index
    %c0_6 = arith.constant 0 : index
    %14 = vector.load %arg3[%c0_4, %c0_5, %c0_6] : memref<1x8x128xf32, #tpu.memory_space<vmem>>, vector<1x8x128xf32>
    tpu.vector_store %arg3[%c0_4, %c0_5, %c0_6], %13 {strides = array<i32>} : memref<1x8x128xf32, #tpu.memory_space<vmem>>, vector<1x8x128xf32>,
    return
  }
  func.func @transform_0(%arg0: i32) -> (i32, i32) {
    %c0_i32 = arith.constant 0 : i32
    %c0_i32_0 = arith.constant 0 : i32
    return %arg0, %c0_i32 : i32, i32
  }
  func.func @transform_1(%arg0: i32) -> (i32, i32) {
    %c0_i32 = arith.constant 0 : i32
    %c0_i32_0 = arith.constant 0 : i32
    return %arg0, %c0_i32 : i32, i32
  }
  func.func @transform_2(%arg0: i32) -> (i32, i32, i32) {
    %c0_i32 = arith.constant 0 : i32
    %c0_i32_0 = arith.constant 0 : i32
    %c0_i32_1 = arith.constant 0 : i32
    return %arg0, %c0_i32, %c0_i32_0 : i32, i32, i32
  }
}

</mosaic_0001>

<bundles_post_ra>
// kernel: tpu_custom_call.1
= control target key start
LH: loop header
LB: loop body
LE: loop exit
PB: predicated region body
PF: predicated region fallthrough
CT: control target
= control target key end

     0   :  { %7 = vsyncpa [#allocation3], 0  ;;  %s765_s0 = inlined_call_operand.hbm [shape: f32[16,64], index: 0, kind: input, shape index: {}]   ;;  %s766_s1 = inlined_call_operand.hbm [shape: f32[16,64], index: 1, kind: input, shape index: {}]   ;;  %s767_s2 = inlined_call_operand.hbm [shape: f32[2,8,128], index: 2, kind: output, shape index: {}]  }
   0x1   :  { %9 = vsyncpa [#allocation3 + $0x1], 0 }
   0x2   :  { %10 = vsyncpa [#allocation6], 0 }
   0x3   :  { %12 = vsyncpa [#allocation6 + $0x1], 0 }
   0x4   :  { %13 = vsyncpa [#allocation4], 0 }
   0x5   :  { %15 = vsyncpa [#allocation4 + $0x1], 0  ;;  %s551_s9 = smov 0   ;;  %s553_s10 = smov 0  }
   0x6   :  { %s555_s11 = smov 0   ;;  %s557_s12 = smov 0  }
   0x7 LB: > { %s572_s13 = sadd.s32 4294967295, %s531_s12   ;;  %s331_s14 = sadd.s32 4294967294, %s531_s12   ;;  %s531_s12 = sphi %s557_s12, %s786_s12   ;;  %s527_s11 = sphi %s555_s11, %s785_s11   ;;  %s523_s10 = sphi %s553_s10, %s784_s10   ;;  %s519_s9 = sphi %s551_s9, %s783_s9  }
   0x8   : > { %s576_s15 = sadd.s32 1, %s531_s12   ;;  %s28_s16 = sadd.s32 1, %s527_s11 }
   0x9   : > { %s25_s17 = ssub.s32 %s531_s12, %s576_s15  ;;  %p35_p0 = scmp.ne.s32.totalorder %s527_s11, %s523_s10 }
   0xa   : > { %p26_p1 = scmp.eq.s32.totalorder %s25_s17, 0  ;;  %p36_p2 = scmp.eq.s32.totalorder %s531_s12, 0 }
   0xb   : > { %p41_p3 = scmp.ne.s32.totalorder %s523_s10, %s519_s9  ;;  %p42_p4 = scmp.eq.s32.totalorder %s572_s13, 0 }
   0xc   : > { %s588_s18 = scalar_select %p26_p1, %s527_s11, %s28_s16  }
   0xd   : > { %p590_p5 = por %p36_p2, %p35_p0  ;;  %p594_p6 = por %p42_p4, %p41_p3 }
   0xe   : > { %p91_p7 = scmp.eq.s32.totalorder %s572_s13, 1  ;;  %p97_p8 = scmp.eq.s32.totalorder %s331_s14, 1 }
   0xf   : > { %s771_s20 = scalar_select %p594_p6, 1, 0 }
  0x10   : > { %p365_p10 = scmp.lt.s32.totalorder %s531_s12, 2  ;;  %p601_p11 = por %p91_p7, %p35_p0 }
  0x11   : > { %p605_p12 = por %p97_p8, %p41_p3  ;;  %s610_s23 = sand.u32 1, %s527_s11  }
  0x12   : > { %s772_s21 = scalar_select %p601_p11, 1, 0 }
  0x13   : > { %s773_s22 = scalar_select %p605_p12, 1, 0 }
  0x14   : > { %s335_s24 = sshll.u32 %s531_s12, 7  ;;  %s334_s25 = sshll.u32 %s610_s23, 3 }
  0x15   : > { %s619_s28 = scalar_lea.hbm %s765_s0, %s335_s24  ;;  %s121_s29 = scalar_lea.vmem [#allocation2], %s334_s25 }
  0x16   : > { %s128_s30 = sshll.u32 %s121_s29, 4  ;;  %p625_p13 = pnand %p365_p10, %p590_p5  ;;  %s629_s30 = int_to_ptr.vmem [resolvable:$true] %s128_s30 }
  0x17   : > { %s118_s4 = scalar_lea.sflag [#allocation3], %s610_s23  ;;  %s401_s5 = scalar_lea.hbm %s619_s28, 128 }
  0x18   : > { %p402_p2 = scmp.ne.s32.totalorder %s619_s28, %s401_s5  ;;  %p403_p3 = pneg %p625_p13 }
  0x19   : > { %s406_s8 = scalar_lea.hbm %s765_s0, 256  ;;  %p407_p5 = scmp.lt.u32.totalorder %s619_s28, %s765_s0 }
  0x1a   : > { %p404_p4 = pnand %p403_p3, %p402_p2  ;;  %p408_p8 = scmp.lt.u32.totalorder %s406_s8, %s401_s5 }
  0x1b   : > { %p410_p9 = scmp.lt.u32.totalorder %s401_s5, %s619_s28 }
  0x1c   : > { %p405_p7 = pneg %p404_p4  ;;  %p409_p10 = por %p408_p8, %p407_p5 }
  0x1e   : > { %p411_p0 = por %p410_p9, %p409_p10 }
  0x20   : > { %p412_p1 = pnand %p411_p0, %p405_p7 }
  0x22   : > { %415 = shalt.err (!%p412_p1)
}
  0x23   : > { %s416_s17 = scalar_lea.vmem %s629_s30, 128  ;;  %s533_s19 = smov [#allocation2]  }
  0x24   : > { %p417_p2 = scmp.ne.s32.totalorder %s629_s30, %s416_s17  ;;  %s421_s26 = sshll.u32 %s533_s19, 4  ;;  %s422_s26 = int_to_ptr.vmem [resolvable:$false] %s421_s26 }
  0x25   : > { %s423_s27 = scalar_lea.vmem %s422_s26, 256  ;;  %p424_p11 = scmp.lt.s32.totalorder %s629_s30, %s422_s26 }
  0x26   : > { %p419_p4 = pnand %p417_p2, %p403_p3  ;;  %p425_p5 = scmp.lt.s32.totalorder %s423_s27, %s416_s17 }
  0x28   : > { %p420_p12 = pneg %p419_p4  ;;  %p426_p8 = por %p425_p5, %p424_p11 }
  0x2a   : > { %p427_p9 = pnand %p426_p8, %p420_p12 }
  0x2c   : > { %430 = shalt.err (!%p427_p9)
}
  0x2d   : > { %357 = dma.hbm_to_vmem [thread:$0]  (!%p625_p13), %s619_s28, 128, %s629_s30, %s118_s4  }
  0x2e   : > { %p775_p0 = scmp.lt.s32.totalorder %s531_s12, 3  ;;  %p776_p1 = scmp.ge.s32.totalorder %s531_s12, 1 }
  0x2f   : > { %s672_s7 = scalar_lea.hbm %s766_s1, %s335_s24  ;;  %s139_s8 = scalar_lea.vmem [#allocation5], %s334_s25 }
  0x30   : > { %p663_p7 = pnand %p776_p1, %p775_p0  ;;  %s146_s14 = sshll.u32 %s139_s8, 4  ;;  %s147_s14 = int_to_ptr.vmem [resolvable:$true] %s146_s14 }
  0x31   : > { %s136_s28 = scalar_lea.sflag [#allocation6], %s610_s23  ;;  %s431_s30 = scalar_lea.hbm %s672_s7, 128 }
  0x32   : > { %s777_s29 = scalar_select %p663_p7, 1, 0 }
  0x33   : > { %p432_p11 = scmp.ne.s32.totalorder %s672_s7, %s431_s30  ;;  %s436_s24 = scalar_lea.hbm %s766_s1, 256 }
  0x34   : > { %p437_p2 = scmp.lt.u32.totalorder %s672_s7, %s766_s1  ;;  %p438_p4 = scmp.lt.u32.totalorder %s436_s24, %s431_s30 }
  0x35   : > { %p434_p12 = pnand %p432_p11, %p403_p3  ;;  %p440_p8 = scmp.lt.u32.totalorder %s431_s30, %s672_s7 }
  0x36   : > { %p439_p5 = por %p438_p4, %p437_p2 }
  0x37   : > { %p435_p10 = pneg %p434_p12 }
  0x38   : > { %p441_p9 = por %p440_p8, %p439_p5 }
  0x3a   : > { %p442_p0 = pnand %p441_p9, %p435_p10 }
  0x3c   : > { %445 = shalt.err (!%p442_p0)
}
  0x3d   : > { %s446_s23 = scalar_lea.vmem %s147_s14, 128  ;;  %s534_s25 = smov [#allocation5]  }
  0x3e   : > { %p447_p1 = scmp.ne.s32.totalorder %s147_s14, %s446_s23  ;;  %s451_s26 = sshll.u32 %s534_s25, 4  ;;  %s452_s26 = int_to_ptr.vmem [resolvable:$false] %s451_s26 }
  0x3f   : > { %s453_s27 = scalar_lea.vmem %s452_s26, 256  ;;  %p454_p6 = scmp.lt.s32.totalorder %s147_s14, %s452_s26 }
  0x40   : > { %p449_p11 = pnand %p447_p1, %p403_p3  ;;  %p455_p7 = scmp.lt.s32.totalorder %s453_s27, %s446_s23 }
  0x42   : > { %p450_p12 = pneg %p449_p11  ;;  %p456_p2 = por %p455_p7, %p454_p6 }
  0x44   : > { %p457_p4 = pnand %p456_p2, %p450_p12 }
  0x46   : > { %460 = shalt.err (!%p457_p4)
}
  0x47   : > { %360 = dma.hbm_to_vmem [thread:$0]  (!%p625_p13), %s672_s7, 128, %s147_s14, %s136_s28  }
  0x48   : > { %p778_p10 = scmp.ne.s32.totalorder %s777_s29, 0 }
  0x49   : > { %s699_s5 = sand.u32 (!%p778_p10), 1, %s523_s10   ;;  %p779_p6 = scmp.ne.s32.totalorder (!%p778_p10), %s771_s20, 0 }
  0x4a   : > { %155 = sbr.rel (%p778_p10) target bundleno = 467 (0x1d3), region = 28  ;;  %s702_s6 = sshll.u32 (!%p778_p10), %s699_s5, 3 }
  0x4b   : > { %s158_s8 = scalar_lea.sflag (!%p778_p10), [#allocation3], %s699_s5  ;;  %s161_s30 = scalar_lea.vmem (!%p778_p10), [#allocation2], %s702_s6 }
  0x51   : > { %506 = dma.done.wait (%p779_p6), %s158_s8, 128  }
  0x52   : > { %508 = vsyncadd (%p779_p6), %s158_s8, 4294967168  ;;  %s167_s3 = scalar_lea.sflag [#allocation6], %s699_s5  ;;  %s170_s29 = scalar_lea.vmem [#allocation5], %s702_s6 }
  0x53   : > { %510 = dma.done.wait (%p779_p6), %s167_s3, 128  }
  0x54   : > { %512 = vsyncadd (%p779_p6), %s167_s3, 4294967168  ;;  %v196_v0 = vld [vmem:[%s161_s30] sm:$0xff]  ;;  %v197_v1 = vld [vmem:[%s170_s29] sm:$0xff]  ;;  %vm200_vm0 = vcmask 523264   ;;  %vm211_vm2 = vcmask 7168   ;;  %s195_s20 = scalar_lea.vmem [#allocation7], %s702_s6 }
  0x55   : > { %v198_v2 = vsub.f32 %v196_v0, %v197_v1  ;;  %s238_s7 = sshll.u32 %s195_s20, 4  ;;  %s343_s14 = sshll.u32 %s572_s13, 7  ;;  %s718_s7 = int_to_ptr.vmem [resolvable:$true] %s238_s7 }
  0x56   : > { %s723_s24 = scalar_lea.hbm %s767_s2, %s343_s14  ;;  %s225_s17 = scalar_lea.sflag [#allocation4], %s699_s5 }
  0x57   : > { %v199_v3 = vmul.f32 %v198_v2, %v198_v2  ;;  %s461_s19 = scalar_lea.vmem %s718_s7, 128  ;;  %p780_p3 = scmp.ne.s32.totalorder %s772_s21, 0 }
  0x58   : > { %p462_p13 = scmp.ne.s32.totalorder %s718_s7, %s461_s19  ;;  %s535_s13 = smov [#allocation7]  }
  0x59   : > { %v201_v4 = vsel %vm200_vm0, %v199_v3, 0.0  ;;  %s465_s23 = sshll.u32 %s535_s13, 4  ;;  %s466_s23 = int_to_ptr.vmem [resolvable:$false] %s465_s23 }
  0x5a   : > { %202 = vadd.xlane.f32.xlu0 %v201_v4  ;;  %p463_p7 = pnand %p462_p13, %p780_p3  ;;  %s467_s25 = scalar_lea.vmem %s466_s23, 256 }
  0x5b   : > { %p468_p8 = scmp.lt.s32.totalorder %s718_s7, %s466_s23  ;;  %p469_p9 = scmp.lt.s32.totalorder %s467_s25, %s461_s19 }
  0x5c   : > { %p464_p5 = pneg %p463_p7 }
  0x5d   : > { %p470_p0 = por %p469_p9, %p468_p8 }
  0x5f   : > { %p471_p1 = pnand %p470_p0, %p464_p5 }
  0xe7   : > { %v203_v5 = vpop.xlane.xlu0 %202 }
  0xe8   : > { %399 = vrsqrt.f32 %v203_v5  ;;  %vm206_vm1 = vcmp.eq.f32.partialorder %v203_v5, inf  ;;  %v209_v8 = vand.u32 2147483648, %v203_v5  ;;  %vm208_vm3 = vcmp.eq.f32.partialorder %v203_v5, 0.0 }
  0xf2   : > { %v400_v6 = vpop.eup %399 }
  0xf3   : > { %v205_v7 = vmul.f32 %v400_v6, %v203_v5 }
  0xf5   : > { %v207_v9 = vsel %vm206_vm1, %v203_v5, %v205_v7 }
  0xf6   : > { %v210_v10 = vsel %vm208_vm3, %v209_v8, %v207_v9 }
  0xf7   : > { %v212_v11 = vsel %vm211_vm2, %v210_v10, 0.0 }
  0xf8   : > { %213 = vadd.xlane.f32.xlu0 %v212_v11 }
 0x185   : > { %v214_v12 = vpop.xlane.xlu0 %213 }
 0x186   : > { %v215_v13 = vrot.slane %v214_v12, 4 }
 0x188   : > { %v216_v14 = vadd.f32 %v215_v13, %v214_v12 }
 0x18a   : > { %v217_v15 = vrot.slane %v216_v14, 2 }
 0x18c   : > { %v218_v16 = vadd.f32 %v217_v15, %v216_v14 }
 0x18e   : > { %v219_v17 = vrot.slane %v218_v16, 1 }
 0x190   : > { %v220_v18 = vadd.f32 %v219_v17, %v218_v16 }
 0x192   : > { %346 = vpush %v220_v18 }
 0x1c3   : > { %s347_s28 = spop %346 }
 0x1c4   : > { %v222_v19 = vstv %s347_s28 }
 0x1c5   : > { %223 = vst [vmem:[%s195_s20] sm:$0xff] %v222_v19 }
 0x1c6   : > { %474 = shalt.err (!%p471_p1)
}
 0x1c7   : > { %s475_s26 = scalar_lea.hbm %s723_s24, 128  ;;  %s479_s6 = scalar_lea.hbm %s767_s2, 256 }
 0x1c8   : > { %p476_p11 = scmp.ne.s32.totalorder %s723_s24, %s475_s26  ;;  %p480_p4 = scmp.lt.u32.totalorder %s723_s24, %s767_s2 }
 0x1c9   : > { %p481_p10 = scmp.lt.u32.totalorder %s479_s6, %s475_s26  ;;  %p483_p13 = scmp.lt.u32.totalorder %s475_s26, %s723_s24 }
 0x1ca   : > { %p477_p12 = pnand %p476_p11, %p780_p3 }
 0x1cb   : > { %p482_p6 = por %p481_p10, %p480_p4 }
 0x1cc   : > { %p478_p2 = pneg %p477_p12 }
 0x1cd   : > { %p484_p7 = por %p483_p13, %p482_p6 }
 0x1cf   : > { %p485_p5 = pnand %p484_p7, %p478_p2 }
 0x1d1   : > { %488 = shalt.err (!%p485_p5)
}
 0x1d2   : > { %352 = dma.vmem_to_hbm [thread:$0]  (%p780_p3), %s718_s7, 128, %s723_s24, %s225_s17  }
 0x1d3 PF: > { %s250_s3 = sand.u32 1, %s519_s9   ;;  %p781_p8 = scmp.ne.s32.totalorder %s773_s22, 0 }
 0x1d4   : > { %p782_p9 = scmp.ge.s32.totalorder %s531_s12, 2  ;;  %s251_s29 = scalar_lea.sflag [#allocation4], %s250_s3 }
 0x1d6   : > { %p362_p0 = pnand %p782_p9, %p781_p8 }
 0x1d8   : > { %514 = dma.done.wait (!%p362_p0), %s251_s29, 128  }
 0x1d9   : > { %516 = vsyncadd (!%p362_p0), %s251_s29, 4294967168  ;;  %p18_p1 = scmp.ge.s32.totalorder %s576_s15, 4   ;;  %s783_s9 = smov %s523_s10 }
 0x1da   : > { %s784_s10 = smov %s527_s11  ;;  %s785_s11 = smov %s588_s18 }
 0x1db   : > { %s786_s12 = smov %s576_s15  ;;  %20 = sbr.rel (!%p18_p1) target bundleno = 7 (0x7), region = 86 }
 0x1e2   :  { %256 = vsyncpa [#allocation3], 1 }
 0x1e3   :  { %258 = vsyncpa [#allocation3 + $0x1], 1 }
 0x1e4   :  { %259 = vsyncpa [#allocation6], 1 }
 0x1e5   :  { %261 = vsyncpa [#allocation6 + $0x1], 1 }
 0x1e6   :  { %262 = vsyncpa [#allocation4], 1 }
 0x1e7   :  { %264 = vsyncpa [#allocation4 + $0x1], 1 }

</bundles_post_ra>
